<compile_context>
chip_gen: v7x
topology: tpu7x:2x2x1
jax: 0.10.0
libtpu: 0.0.40
codegen_flags: <defaults>
</compile_context>

<pallas_src>
import functools
import math

import jax
import jax.numpy as jnp
from jax import lax
from jax.experimental import pallas as pl
from jax.experimental.pallas import tpu as pltpu


def msattn_kernel(*refs, num_heads, head_size, block_q, num_q_blocks, add_pos):
    if add_pos:
        (x_ref, pos_ref, wq_ref, bq_ref, wkv_ref, bkv_ref,
         o_ref, kv_ref, acc_ref) = refs
    else:
        (x_ref, wq_ref, bq_ref, wkv_ref, bkv_ref,
         o_ref, kv_ref, acc_ref) = refs
        pos_ref = None

    in_dt = x_ref.dtype
    hidden = num_heads * head_size
    q_idx = pl.program_id(1)

    # ---- K/V projection: computed once per batch tile (q tile 0), cached in
    # VMEM scratch and reused by every other q tile of this batch tile.
    @pl.when(q_idx == 0)
    def _():
        xkv = x_ref[...]                                    # (Bt, N, H)
        if add_pos:
            xkv = (xkv + pos_ref[...]).astype(in_dt)
        kv = lax.dot_general(xkv, wkv_ref[...],
                             dimension_numbers=(((2,), (0,)), ((), ())),
                             preferred_element_type=jnp.float32)
        # Single cast: the f32 (Bt, N, 2H) intermediate dies right here.
        kv_ref[...] = (kv + bkv_ref[...]).astype(in_dt)

    # ---- Q projection for just this q tile's rows (sliced from the shared
    # hidden_states block; no duplicated DMA of the same rows).
    if num_q_blocks == 1:
        xq = x_ref[...]
        if add_pos:
            xq = (xq + pos_ref[...]).astype(in_dt)
    else:
        start = pl.multiple_of(q_idx * block_q, block_q)
        xq = x_ref[:, pl.ds(start, block_q), :]
        if add_pos:
            xq = (xq + pos_ref[:, pl.ds(start, block_q), :]).astype(in_dt)

    # 1/sqrt(head_size) is pre-folded into wq/bq on the host.
    q = lax.dot_general(xq, wq_ref[...],
                        dimension_numbers=(((2,), (0,)), ((), ())),
                        preferred_element_type=jnp.float32)
    q = (q + bq_ref[...]).astype(in_dt)                     # (Bt, tq, H)

    # ---- Per-head attention. Contexts are accumulated into a full-width VMEM
    # scratch so the HBM writeback is a single lane-dense store.
    for h in range(num_heads):
        sl = slice(h * head_size, (h + 1) * head_size)
        vsl = slice(hidden + h * head_size, hidden + (h + 1) * head_size)
        qh = q[:, :, sl]                                    # (Bt, tq, d)
        kh = kv_ref[:, :, sl]                               # (Bt, N,  d)
        vh = kv_ref[:, :, vsl]                              # (Bt, N,  d)

        # q @ k^T without materializing a transpose (contract d, batch Bt).
        s = lax.dot_general(qh, kh,
                            dimension_numbers=(((2,), (2,)), ((0,), (0,))),
                            preferred_element_type=jnp.float32)   # (Bt, tq, N)

        # Numerically stable softmax in f32; reciprocal goes to the EUP slot.
        s = s - jnp.max(s, axis=-1, keepdims=True)
        p = jnp.exp(s)
        inv = pl.reciprocal(jnp.sum(p, axis=-1, keepdims=True), approx=True)
        p = (p * inv).astype(in_dt)

        acc_ref[:, :, sl] = lax.dot_general(
            p, vh,
            dimension_numbers=(((2,), (1,)), ((0,), (0,))),
            preferred_element_type=jnp.float32)             # (Bt, tq, d)

    o_ref[...] = acc_ref[...].astype(o_ref.dtype)           # one full-width store


def ms_attention(hidden_states, pos_emb, wq, bq, wk, bk, wv, bv,
                 *, num_heads, first_block=False, block_b=1, block_q=None):
    B, N, H = hidden_states.shape
    assert H % num_heads == 0
    head_size = H // num_heads
    if block_q is None:
        block_q = N
    assert B % block_b == 0 and N % block_q == 0
    num_q_blocks = N // block_q

    # Host-side (free) prep: fold the attention scale into the Q projection and
    # fuse K/V weights/biases into a single (H, 2H) / (1, 2H) operand.
    scale = 1.0 / math.sqrt(head_size)
    wq_s = (wq * scale).astype(wq.dtype)
    bq_s = (bq * scale).astype(bq.dtype)
    wkv = jnp.concatenate([wk, wv], axis=1)
    bkv = jnp.concatenate([bk, bv], axis=1)

    # Grid-invariant operands: single-buffered.
    def const_spec(shape):
        return pl.BlockSpec(shape, lambda b, q: (0,) * len(shape),
                            pipeline_mode=pl.Buffered(1))

    in_specs = [pl.BlockSpec((block_b, N, H), lambda b, q: (b, 0, 0))]
    operands = [hidden_states]
    if first_block:
        in_specs.append(pl.BlockSpec((1, N, H), lambda b, q: (0, 0, 0),
                                     pipeline_mode=pl.Buffered(1)))
        operands.append(pos_emb)
    in_specs += [
        const_spec((H, H)),        # Wq (scale folded in)
        const_spec((1, H)),        # bq (scale folded in)
        const_spec((H, 2 * H)),    # fused [Wk | Wv]
        const_spec((1, 2 * H)),    # fused [bk | bv]
    ]
    operands += [wq_s, bq_s, wkv, bkv]

    kernel = functools.partial(
        msattn_kernel,
        num_heads=num_heads,
        head_size=head_size,
        block_q=block_q,
        num_q_blocks=num_q_blocks,
        add_pos=first_block,
    )

    # VMEM budget from the actual per-step footprint (+2x headroom for
    # compiler-internal scratch), clamped to v7x's 64 MiB per-TC capacity.
    in_b = hidden_states.dtype.itemsize
    w_b = wq.dtype.itemsize
    est = (2 * block_b * N * H * in_b                    # x block (double-buffered)
           + (N * H * in_b if first_block else 0)        # pos emb (single-buffered)
           + (3 * H * H + 3 * H) * w_b                   # weights/biases
           + 2 * block_b * block_q * H * in_b            # out block (double-buffered)
           + block_b * N * 2 * H * in_b                  # kv scratch
           + block_b * block_q * H * 4                   # acc scratch
           + block_b * N * 2 * H * 4                     # f32 kv intermediate
           + block_b * block_q * N * 4                   # one f32 score tile
           + block_b * block_q * H * 4)                  # f32 q intermediate
    vmem_limit = int(min(64 * 1024 * 1024, max(16 * 1024 * 1024, 2 * est)))

    return pl.pallas_call(
        kernel,
        out_shape=jax.ShapeDtypeStruct((B, N, H), hidden_states.dtype),
        grid_spec=pltpu.PrefetchScalarGridSpec(
            num_scalar_prefetch=0,
            grid=(B // block_b, num_q_blocks),
            in_specs=in_specs,
            out_specs=pl.BlockSpec((block_b, block_q, H),
                                   lambda b, q: (b, q, 0)),
            scratch_shapes=[
                pltpu.VMEM((block_b, N, 2 * H), hidden_states.dtype),   # kv cache
                pltpu.VMEM((block_b, block_q, H), jnp.float32),         # ctx acc
            ],
        ),
        compiler_params=pltpu.CompilerParams(
            # kv caching requires the q axis to stay sequential per batch tile;
            # the batch axis feeds both TensorCores on v7x.
            dimension_semantics=("parallel", "arbitrary"),
            vmem_limit_bytes=vmem_limit,
        ),
    )(*operands)


def ms_attention_ref(hidden_states, pos_emb, wq, bq, wk, bk, wv, bv,
                     *, num_heads, first_block=False):
    """Pure-JAX reference mirroring the PyTorch forward."""
    B, N, H = hidden_states.shape
    d = H // num_heads
    x = hidden_states + pos_emb if first_block else hidden_states
    q = x @ wq + bq[0]
    k = x @ wk + bk[0]
    v = x @ wv + bv[0]

    def to_score(m):                       # (B, N, H) -> (B, heads, N, d)
        return m.reshape(B, N, num_heads, d).transpose(0, 2, 1, 3)

    qh, kh, vh = to_score(q), to_score(k), to_score(v)
    s = jnp.einsum("bhqd,bhkd->bhqk", qh, kh) / math.sqrt(d)
    p = jax.nn.softmax(s, axis=-1)
    ctx = jnp.einsum("bhqk,bhkd->bhqd", p, vh)
    return ctx.transpose(0, 2, 1, 3).reshape(B, N, H)


def _make_params(key, H):
    kwq, kbq, kwk, kbk, kwv, kbv = jax.random.split(key, 6)
    lim = 1.0 / math.sqrt(H)
    wq = jax.random.uniform(kwq, (H, H), jnp.float32, -lim, lim)
    bq = jax.random.uniform(kbq, (1, H), jnp.float32, -lim, lim)
    wk = jax.random.uniform(kwk, (H, H), jnp.float32, -lim, lim)
    bk = jax.random.uniform(kbk, (1, H), jnp.float32, -lim, lim)
    wv = jax.random.uniform(kwv, (H, H), jnp.float32, -lim, lim)
    bv = jax.random.uniform(kbv, (1, H), jnp.float32, -lim, lim)
    return wq, bq, wk, bk, wv, bv


if __name__ == "__main__":
    # Small ViT-like config: hidden=32, heads=4 (head_size=8), num_patchs=8, batch=2.
    B, N, H, NUM_HEADS = 2, 8, 32, 4

    key = jax.random.PRNGKey(0)
    kx, kp, kw, kx2, kp2 = jax.random.split(key, 5)

    hidden_states = jax.random.normal(kx, (B, N, H), dtype=jnp.float32)
    pos_emb = jax.random.normal(kp, (1, N, H), dtype=jnp.float32)
    wq, bq, wk, bk, wv, bv = _make_params(kw, H)

    # Tolerance loosened slightly for the EUP approximate reciprocal in softmax.
    TOL = dict(atol=2e-2, rtol=2e-2)

    # first_block=True path (position embeddings added inside the kernel).
    out1 = jax.block_until_ready(
        ms_attention(hidden_states, pos_emb, wq, bq, wk, bk, wv, bv,
                     num_heads=NUM_HEADS, first_block=True))
    ref1 = ms_attention_ref(hidden_states, pos_emb, wq, bq, wk, bk, wv, bv,
                            num_heads=NUM_HEADS, first_block=True)
    assert out1.shape == (B, N, H)
    assert jnp.allclose(out1, ref1, **TOL), \
        "Pallas vs reference mismatch (first_block=True)"

    # first_block=False path (pos_emb operand omitted from the pallas_call).
    out2 = jax.block_until_ready(
        ms_attention(hidden_states, pos_emb, wq, bq, wk, bk, wv, bv,
                     num_heads=NUM_HEADS, first_block=False))
    ref2 = ms_attention_ref(hidden_states, pos_emb, wq, bq, wk, bk, wv, bv,
                            num_heads=NUM_HEADS, first_block=False)
    assert jnp.allclose(out2, ref2, **TOL), \
        "Pallas vs reference mismatch (first_block=False)"

    # Tiled-q path: exercises the cached K/V projection (pl.when on q==0) and
    # the in-kernel pl.ds slicing of the query rows / pos embeddings.
    N2 = 16
    hs2 = jax.random.normal(kx2, (B, N2, H), dtype=jnp.float32)
    pe2 = jax.random.normal(kp2, (1, N2, H), dtype=jnp.float32)
    out3 = jax.block_until_ready(
        ms_attention(hs2, pe2, wq, bq, wk, bk, wv, bv,
                     num_heads=NUM_HEADS, first_block=True, block_q=8))
    ref3 = ms_attention_ref(hs2, pe2, wq, bq, wk, bk, wv, bv,
                            num_heads=NUM_HEADS, first_block=True)
    assert jnp.allclose(out3, ref3, **TOL), \
        "Pallas vs reference mismatch (tiled q, first_block=True)"

    print("KERNEL_OK")
</pallas_src>

<mosaic_0001>
module attributes {stable_mosaic.version = 11 : i64} {
  func.func @msattn_kernel(%arg0: i32, %arg1: i32, %arg2: memref<1x8x32xf32, #tpu.memory_space<vmem>>, %arg3: memref<1x8x32xf32, #tpu.memory_space<vmem>>, %arg4: memref<32x32xf32, #tpu.memory_space<vmem>>, %arg5: memref<1x32xf32, #tpu.memory_space<vmem>>, %arg6: memref<32x64xf32, #tpu.memory_space<vmem>>, %arg7: memref<1x64xf32, #tpu.memory_space<vmem>>, %arg8: memref<1x8x32xf32, #tpu.memory_space<vmem>>, %arg9: memref<1x8x64xf32, #tpu.memory_space<vmem>>, %arg10: memref<1x8x32xf32, #tpu.memory_space<vmem>>) attributes {dimension_semantics = [#tpu.dimension_semantics<parallel>, #tpu.dimension_semantics<arbitrary>], iteration_bounds = array<i64: 2, 1>, scalar_prefetch = 0 : i64, scratch_operands = 2 : i64, tpu.core_type = #tpu.core_type<tc>, window_params = [{transform_indices = @transform_0, window_bounds = array<i64: 1, 8, 32>}, {pipeline_mode = #tpu.pipeline_mode<synchronous>, transform_indices = @transform_1, window_bounds = array<i64: 1, 8, 32>}, {pipeline_mode = #tpu.pipeline_mode<synchronous>, transform_indices = @transform_2, window_bounds = array<i64: 32, 32>}, {pipeline_mode = #tpu.pipeline_mode<synchronous>, transform_indices = @transform_3, window_bounds = array<i64: 1, 32>}, {pipeline_mode = #tpu.pipeline_mode<synchronous>, transform_indices = @transform_4, window_bounds = array<i64: 32, 64>}, {pipeline_mode = #tpu.pipeline_mode<synchronous>, transform_indices = @transform_5, window_bounds = array<i64: 1, 64>}, {transform_indices = @transform_6, window_bounds = array<i64: 1, 8, 32>}]} {
    %c0_i32 = arith.constant 0 : i32
    %0 = arith.cmpi eq, %arg1, %c0_i32 : i32
    %1 = arith.extui %0 : i1 to i32
    %c0_i32_0 = arith.constant 0 : i32
    %2 = arith.cmpi ne, %1, %c0_i32_0 : i32
    scf.if %2 {
      %c0_61 = arith.constant 0 : index
      %c0_62 = arith.constant 0 : index
      %c0_63 = arith.constant 0 : index
      %78 = vector.load %arg2[%c0_61, %c0_62, %c0_63] : memref<1x8x32xf32, #tpu.memory_space<vmem>>, vector<1x8x32xf32>
      %c0_64 = arith.constant 0 : index
      %c0_65 = arith.constant 0 : index
      %c0_66 = arith.constant 0 : index
      %79 = vector.load %arg3[%c0_64, %c0_65, %c0_66] : memref<1x8x32xf32, #tpu.memory_space<vmem>>, vector<1x8x32xf32>
      %80 = arith.addf %78, %79 : vector<1x8x32xf32>
      %c0_67 = arith.constant 0 : index
      %c0_68 = arith.constant 0 : index
      %81 = vector.load %arg6[%c0_67, %c0_68] : memref<32x64xf32, #tpu.memory_space<vmem>>, vector<32x64xf32>
      %cst_69 = arith.constant dense<0.000000e+00> : vector<1x8x64xf32>
      %82 = tpu.matmul %80, %81, %cst_69 {dimension_numbers = #tpu.dot_dimension_numbers<[2], [0], [0, 1], [1], [0, 0, 0, 1, 1, 1], [], []>} : vector<1x8x32xf32>, vector<32x64xf32>, vector<1x8x64xf32> -> vector<1x8x64xf32>
      %c0_70 = arith.constant 0 : index
      %c0_71 = arith.constant 0 : index
      %83 = vector.load %arg7[%c0_70, %c0_71] : memref<1x64xf32, #tpu.memory_space<vmem>>, vector<1x64xf32>
      %84 = vector.shape_cast %83 : vector<1x64xf32> to vector<1x1x64xf32>
      %85 = vector.broadcast %84 : vector<1x1x64xf32> to vector<1x8x64xf32>
      %86 = arith.addf %82, %85 : vector<1x8x64xf32>
      %c0_72 = arith.constant 0 : index
      %c0_73 = arith.constant 0 : index
      %c0_74 = arith.constant 0 : index
      %87 = vector.load %arg9[%c0_72, %c0_73, %c0_74] : memref<1x8x64xf32, #tpu.memory_space<vmem>>, vector<1x8x64xf32>
      tpu.vector_store %arg9[%c0_72, %c0_73, %c0_74], %86 {strides = array<i32>} : memref<1x8x64xf32, #tpu.memory_space<vmem>>, vector<1x8x64xf32>,
    } else {
    }
    %c0 = arith.constant 0 : index
    %c0_1 = arith.constant 0 : index
    %c0_2 = arith.constant 0 : index
    %3 = vector.load %arg2[%c0, %c0_1, %c0_2] : memref<1x8x32xf32, #tpu.memory_space<vmem>>, vector<1x8x32xf32>
    %c0_3 = arith.constant 0 : index
    %c0_4 = arith.constant 0 : index
    %c0_5 = arith.constant 0 : index
    %4 = vector.load %arg3[%c0_3, %c0_4, %c0_5] : memref<1x8x32xf32, #tpu.memory_space<vmem>>, vector<1x8x32xf32>
    %5 = arith.addf %3, %4 : vector<1x8x32xf32>
    %c0_6 = arith.constant 0 : index
    %c0_7 = arith.constant 0 : index
    %6 = vector.load %arg4[%c0_6, %c0_7] : memref<32x32xf32, #tpu.memory_space<vmem>>, vector<32x32xf32>
    %cst = arith.constant dense<0.000000e+00> : vector<1x8x32xf32>
    %7 = tpu.matmul %5, %6, %cst {dimension_numbers = #tpu.dot_dimension_numbers<[2], [0], [0, 1], [1], [0, 0, 0, 1, 1, 1], [], []>} : vector<1x8x32xf32>, vector<32x32xf32>, vector<1x8x32xf32> -> vector<1x8x32xf32>
    %c0_8 = arith.constant 0 : index
    %c0_9 = arith.constant 0 : index
    %8 = vector.load %arg5[%c0_8, %c0_9] : memref<1x32xf32, #tpu.memory_space<vmem>>, vector<1x32xf32>
    %9 = vector.shape_cast %8 : vector<1x32xf32> to vector<1x1x32xf32>
    %10 = vector.broadcast %9 : vector<1x1x32xf32> to vector<1x8x32xf32>
    %11 = arith.addf %7, %10 : vector<1x8x32xf32>
    %12 = vector.extract_strided_slice %11 {offsets = [0, 0, 0], sizes = [1, 8, 8], strides = [1, 1, 1]} : vector<1x8x32xf32> to vector<1x8x8xf32>
    %c0_10 = arith.constant 0 : index
    %c0_11 = arith.constant 0 : index
    %c0_12 = arith.constant 0 : index
    %13 = vector.load %arg9[%c0_10, %c0_11, %c0_12] : memref<1x8x64xf32, #tpu.memory_space<vmem>>, vector<1x8x8xf32>
    %c0_13 = arith.constant 0 : index
    %c0_14 = arith.constant 0 : index
    %c32 = arith.constant 32 : index
    %14 = vector.load %arg9[%c0_13, %c0_14, %c32] : memref<1x8x64xf32, #tpu.memory_space<vmem>>, vector<1x8x8xf32>
    %cst_15 = arith.constant dense<0.000000e+00> : vector<1x8x8xf32>
    %15 = tpu.matmul %12, %13, %cst_15 {dimension_numbers = #tpu.dot_dimension_numbers<[2], [2], [1], [1], [0, 0, 0, 1, 1, 1], [0], [0]>} : vector<1x8x8xf32>, vector<1x8x8xf32>, vector<1x8x8xf32> -> vector<1x8x8xf32>
    %cst_16 = arith.constant dense<0xFF800000> : vector<1x8xf32>
    %16 = vector.multi_reduction <maximumf>, %15, %cst_16 [2] : vector<1x8x8xf32> to vector<1x8xf32>
    %17 = vector.shape_cast %16 : vector<1x8xf32> to vector<1x8x1xf32>
    %18 = vector.broadcast %17 : vector<1x8x1xf32> to vector<1x8x8xf32>
    %19 = arith.subf %15, %18 : vector<1x8x8xf32>
    %20 = math.exp %19 : vector<1x8x8xf32>
    %cst_17 = arith.constant dense<0.000000e+00> : vector<1x8xf32>
    %21 = vector.multi_reduction <add>, %20, %cst_17 [2] : vector<1x8x8xf32> to vector<1x8xf32>
    %22 = vector.shape_cast %21 : vector<1x8xf32> to vector<1x8x1xf32>
    %23 = tpu.reciprocal %22 {approx = true} : vector<1x8x1xf32> -> vector<1x8x1xf32>
    %24 = vector.broadcast %23 : vector<1x8x1xf32> to vector<1x8x8xf32>
    %25 = arith.mulf %20, %24 : vector<1x8x8xf32>
    %cst_18 = arith.constant dense<0.000000e+00> : vector<1x8x8xf32>
    %26 = tpu.matmul %25, %14, %cst_18 {dimension_numbers = #tpu.dot_dimension_numbers<[2], [1], [1], [2], [0, 0, 0, 1, 1, 2], [0], [0]>} : vector<1x8x8xf32>, vector<1x8x8xf32>, vector<1x8x8xf32> -> vector<1x8x8xf32>
    %c0_19 = arith.constant 0 : index
    %c0_20 = arith.constant 0 : index
    %c0_21 = arith.constant 0 : index
    %27 = vector.load %arg10[%c0_19, %c0_20, %c0_21] : memref<1x8x32xf32, #tpu.memory_space<vmem>>, vector<1x8x8xf32>
    tpu.vector_store %arg10[%c0_19, %c0_20, %c0_21], %26 {strides = array<i32>} : memref<1x8x32xf32, #tpu.memory_space<vmem>>, vector<1x8x8xf32>,
    %28 = vector.extract_strided_slice %11 {offsets = [0, 0, 8], sizes = [1, 8, 8], strides = [1, 1, 1]} : vector<1x8x32xf32> to vector<1x8x8xf32>
    %c0_22 = arith.constant 0 : index
    %c0_23 = arith.constant 0 : index
    %c8 = arith.constant 8 : index
    %29 = vector.load %arg9[%c0_22, %c0_23, %c8] : memref<1x8x64xf32, #tpu.memory_space<vmem>>, vector<1x8x8xf32>
    %c0_24 = arith.constant 0 : index
    %c0_25 = arith.constant 0 : index
    %c40 = arith.constant 40 : index
    %30 = vector.load %arg9[%c0_24, %c0_25, %c40] : memref<1x8x64xf32, #tpu.memory_space<vmem>>, vector<1x8x8xf32>
    %cst_26 = arith.constant dense<0.000000e+00> : vector<1x8x8xf32>
    %31 = tpu.matmul %28, %29, %cst_26 {dimension_numbers = #tpu.dot_dimension_numbers<[2], [2], [1], [1], [0, 0, 0, 1, 1, 1], [0], [0]>} : vector<1x8x8xf32>, vector<1x8x8xf32>, vector<1x8x8xf32> -> vector<1x8x8xf32>
    %cst_27 = arith.constant dense<0xFF800000> : vector<1x8xf32>
    %32 = vector.multi_reduction <maximumf>, %31, %cst_27 [2] : vector<1x8x8xf32> to vector<1x8xf32>
    %33 = vector.shape_cast %32 : vector<1x8xf32> to vector<1x8x1xf32>
    %34 = vector.broadcast %33 : vector<1x8x1xf32> to vector<1x8x8xf32>
    %35 = arith.subf %31, %34 : vector<1x8x8xf32>
    %36 = math.exp %35 : vector<1x8x8xf32>
    %cst_28 = arith.constant dense<0.000000e+00> : vector<1x8xf32>
    %37 = vector.multi_reduction <add>, %36, %cst_28 [2] : vector<1x8x8xf32> to vector<1x8xf32>
    %38 = vector.shape_cast %37 : vector<1x8xf32> to vector<1x8x1xf32>
    %39 = tpu.reciprocal %38 {approx = true} : vector<1x8x1xf32> -> vector<1x8x1xf32>
    %40 = vector.broadcast %39 : vector<1x8x1xf32> to vector<1x8x8xf32>
    %41 = arith.mulf %36, %40 : vector<1x8x8xf32>
    %cst_29 = arith.constant dense<0.000000e+00> : vector<1x8x8xf32>
    %42 = tpu.matmul %41, %30, %cst_29 {dimension_numbers = #tpu.dot_dimension_numbers<[2], [1], [1], [2], [0, 0, 0, 1, 1, 2], [0], [0]>} : vector<1x8x8xf32>, vector<1x8x8xf32>, vector<1x8x8xf32> -> vector<1x8x8xf32>
    %c0_30 = arith.constant 0 : index
    %c0_31 = arith.constant 0 : index
    %c8_32 = arith.constant 8 : index
    %43 = vector.load %arg10[%c0_30, %c0_31, %c8_32] : memref<1x8x32xf32, #tpu.memory_space<vmem>>, vector<1x8x8xf32>
    tpu.vector_store %arg10[%c0_30, %c0_31, %c8_32], %42 {strides = array<i32>} : memref<1x8x32xf32, #tpu.memory_space<vmem>>, vector<1x8x8xf32>,
    %44 = vector.extract_strided_slice %11 {offsets = [0, 0, 16], sizes = [1, 8, 8], strides = [1, 1, 1]} : vector<1x8x32xf32> to vector<1x8x8xf32>
    %c0_33 = arith.constant 0 : index
    %c0_34 = arith.constant 0 : index
    %c16 = arith.constant 16 : index
    %45 = vector.load %arg9[%c0_33, %c0_34, %c16] : memref<1x8x64xf32, #tpu.memory_space<vmem>>, vector<1x8x8xf32>
    %c0_35 = arith.constant 0 : index
    %c0_36 = arith.constant 0 : index
    %c48 = arith.constant 48 : index
    %46 = vector.load %arg9[%c0_35, %c0_36, %c48] : memref<1x8x64xf32, #tpu.memory_space<vmem>>, vector<1x8x8xf32>
    %cst_37 = arith.constant dense<0.000000e+00> : vector<1x8x8xf32>
    %47 = tpu.matmul %44, %45, %cst_37 {dimension_numbers = #tpu.dot_dimension_numbers<[2], [2], [1], [1], [0, 0, 0, 1, 1, 1], [0], [0]>} : vector<1x8x8xf32>, vector<1x8x8xf32>, vector<1x8x8xf32> -> vector<1x8x8xf32>
    %cst_38 = arith.constant dense<0xFF800000> : vector<1x8xf32>
    %48 = vector.multi_reduction <maximumf>, %47, %cst_38 [2] : vector<1x8x8xf32> to vector<1x8xf32>
    %49 = vector.shape_cast %48 : vector<1x8xf32> to vector<1x8x1xf32>
    %50 = vector.broadcast %49 : vector<1x8x1xf32> to vector<1x8x8xf32>
    %51 = arith.subf %47, %50 : vector<1x8x8xf32>
    %52 = math.exp %51 : vector<1x8x8xf32>
    %cst_39 = arith.constant dense<0.000000e+00> : vector<1x8xf32>
    %53 = vector.multi_reduction <add>, %52, %cst_39 [2] : vector<1x8x8xf32> to vector<1x8xf32>
    %54 = vector.shape_cast %53 : vector<1x8xf32> to vector<1x8x1xf32>
    %55 = tpu.reciprocal %54 {approx = true} : vector<1x8x1xf32> -> vector<1x8x1xf32>
    %56 = vector.broadcast %55 : vector<1x8x1xf32> to vector<1x8x8xf32>
    %57 = arith.mulf %52, %56 : vector<1x8x8xf32>
    %cst_40 = arith.constant dense<0.000000e+00> : vector<1x8x8xf32>
    %58 = tpu.matmul %57, %46, %cst_40 {dimension_numbers = #tpu.dot_dimension_numbers<[2], [1], [1], [2], [0, 0, 0, 1, 1, 2], [0], [0]>} : vector<1x8x8xf32>, vector<1x8x8xf32>, vector<1x8x8xf32> -> vector<1x8x8xf32>
    %c0_41 = arith.constant 0 : index
    %c0_42 = arith.constant 0 : index
    %c16_43 = arith.constant 16 : index
    %59 = vector.load %arg10[%c0_41, %c0_42, %c16_43] : memref<1x8x32xf32, #tpu.memory_space<vmem>>, vector<1x8x8xf32>
    tpu.vector_store %arg10[%c0_41, %c0_42, %c16_43], %58 {strides = array<i32>} : memref<1x8x32xf32, #tpu.memory_space<vmem>>, vector<1x8x8xf32>,
    %60 = vector.extract_strided_slice %11 {offsets = [0, 0, 24], sizes = [1, 8, 8], strides = [1, 1, 1]} : vector<1x8x32xf32> to vector<1x8x8xf32>
    %c0_44 = arith.constant 0 : index
    %c0_45 = arith.constant 0 : index
    %c24 = arith.constant 24 : index
    %61 = vector.load %arg9[%c0_44, %c0_45, %c24] : memref<1x8x64xf32, #tpu.memory_space<vmem>>, vector<1x8x8xf32>
    %c0_46 = arith.constant 0 : index
    %c0_47 = arith.constant 0 : index
    %c56 = arith.constant 56 : index
    %62 = vector.load %arg9[%c0_46, %c0_47, %c56] : memref<1x8x64xf32, #tpu.memory_space<vmem>>, vector<1x8x8xf32>
    %cst_48 = arith.constant dense<0.000000e+00> : vector<1x8x8xf32>
    %63 = tpu.matmul %60, %61, %cst_48 {dimension_numbers = #tpu.dot_dimension_numbers<[2], [2], [1], [1], [0, 0, 0, 1, 1, 1], [0], [0]>} : vector<1x8x8xf32>, vector<1x8x8xf32>, vector<1x8x8xf32> -> vector<1x8x8xf32>
    %cst_49 = arith.constant dense<0xFF800000> : vector<1x8xf32>
    %64 = vector.multi_reduction <maximumf>, %63, %cst_49 [2] : vector<1x8x8xf32> to vector<1x8xf32>
    %65 = vector.shape_cast %64 : vector<1x8xf32> to vector<1x8x1xf32>
    %66 = vector.broadcast %65 : vector<1x8x1xf32> to vector<1x8x8xf32>
    %67 = arith.subf %63, %66 : vector<1x8x8xf32>
    %68 = math.exp %67 : vector<1x8x8xf32>
    %cst_50 = arith.constant dense<0.000000e+00> : vector<1x8xf32>
    %69 = vector.multi_reduction <add>, %68, %cst_50 [2] : vector<1x8x8xf32> to vector<1x8xf32>
    %70 = vector.shape_cast %69 : vector<1x8xf32> to vector<1x8x1xf32>
    %71 = tpu.reciprocal %70 {approx = true} : vector<1x8x1xf32> -> vector<1x8x1xf32>
    %72 = vector.broadcast %71 : vector<1x8x1xf32> to vector<1x8x8xf32>
    %73 = arith.mulf %68, %72 : vector<1x8x8xf32>
    %cst_51 = arith.constant dense<0.000000e+00> : vector<1x8x8xf32>
    %74 = tpu.matmul %73, %62, %cst_51 {dimension_numbers = #tpu.dot_dimension_numbers<[2], [1], [1], [2], [0, 0, 0, 1, 1, 2], [0], [0]>} : vector<1x8x8xf32>, vector<1x8x8xf32>, vector<1x8x8xf32> -> vector<1x8x8xf32>
    %c0_52 = arith.constant 0 : index
    %c0_53 = arith.constant 0 : index
    %c24_54 = arith.constant 24 : index
    %75 = vector.load %arg10[%c0_52, %c0_53, %c24_54] : memref<1x8x32xf32, #tpu.memory_space<vmem>>, vector<1x8x8xf32>
    tpu.vector_store %arg10[%c0_52, %c0_53, %c24_54], %74 {strides = array<i32>} : memref<1x8x32xf32, #tpu.memory_space<vmem>>, vector<1x8x8xf32>,
    %c0_55 = arith.constant 0 : index
    %c0_56 = arith.constant 0 : index
    %c0_57 = arith.constant 0 : index
    %76 = vector.load %arg10[%c0_55, %c0_56, %c0_57] : memref<1x8x32xf32, #tpu.memory_space<vmem>>, vector<1x8x32xf32>
    %c0_58 = arith.constant 0 : index
    %c0_59 = arith.constant 0 : index
    %c0_60 = arith.constant 0 : index
    %77 = vector.load %arg8[%c0_58, %c0_59, %c0_60] : memref<1x8x32xf32, #tpu.memory_space<vmem>>, vector<1x8x32xf32>
    tpu.vector_store %arg8[%c0_58, %c0_59, %c0_60], %76 {strides = array<i32>} : memref<1x8x32xf32, #tpu.memory_space<vmem>>, vector<1x8x32xf32>,
    return
  }
  func.func @transform_0(%arg0: i32, %arg1: i32) -> (i32, i32, i32) {
    %c0_i32 = arith.constant 0 : i32
    %c0_i32_0 = arith.constant 0 : i32
    %c0_i32_1 = arith.constant 0 : i32
    return %arg0, %c0_i32, %c0_i32_0 : i32, i32, i32
  }
  func.func @transform_1(%arg0: i32, %arg1: i32) -> (i32, i32, i32) {
    %c0_i32 = arith.constant 0 : i32
    %c0_i32_0 = arith.constant 0 : i32
    %c0_i32_1 = arith.constant 0 : i32
    %c0_i32_2 = arith.constant 0 : i32
    return %c0_i32, %c0_i32_0, %c0_i32_1 : i32, i32, i32
  }
  func.func @transform_2(%arg0: i32, %arg1: i32) -> (i32, i32) {
    %c0_i32 = arith.constant 0 : i32
    %c0_i32_0 = arith.constant 0 : i32
    %c0_i32_1 = arith.constant 0 : i32
    return %c0_i32, %c0_i32_0 : i32, i32
  }
  func.func @transform_3(%arg0: i32, %arg1: i32) -> (i32, i32) {
    %c0_i32 = arith.constant 0 : i32
    %c0_i32_0 = arith.constant 0 : i32
    %c0_i32_1 = arith.constant 0 : i32
    return %c0_i32, %c0_i32_0 : i32, i32
  }
  func.func @transform_4(%arg0: i32, %arg1: i32) -> (i32, i32) {
    %c0_i32 = arith.constant 0 : i32
    %c0_i32_0 = arith.constant 0 : i32
    %c0_i32_1 = arith.constant 0 : i32
    return %c0_i32, %c0_i32_0 : i32, i32
  }
  func.func @transform_5(%arg0: i32, %arg1: i32) -> (i32, i32) {
    %c0_i32 = arith.constant 0 : i32
    %c0_i32_0 = arith.constant 0 : i32
    %c0_i32_1 = arith.constant 0 : i32
    return %c0_i32, %c0_i32_0 : i32, i32
  }
  func.func @transform_6(%arg0: i32, %arg1: i32) -> (i32, i32, i32) {
    %c0_i32 = arith.constant 0 : i32
    %c0_i32_0 = arith.constant 0 : i32
    return %arg0, %arg1, %c0_i32 : i32, i32, i32
  }
}

</mosaic_0001>

<bundles_post_ra>
// kernel: tpu_custom_call.1
= control target key start
LH: loop header
LB: loop body
LE: loop exit
PB: predicated region body
PF: predicated region fallthrough
CT: control target
= control target key end

     0   :  { %s2175_s0 = inlined_call_operand.hbm [shape: f32[2,8,32], index: 0, kind: input, shape index: {}]   ;;  %s2176_s1 = inlined_call_operand.hbm [shape: f32[1,8,32], index: 1, kind: input, shape index: {}]   ;;  %s2177_s2 = inlined_call_operand.hbm [shape: f32[32,32], index: 2, kind: input, shape index: {}]   ;;  %s2178_s3 = inlined_call_operand.vmem [shape: f32[1,32], index: 3, kind: input, shape index: {}]   ;;  %s2179_s4 = inlined_call_operand.hbm [shape: f32[32,64], index: 4, kind: input, shape index: {}]   ;;  %s2180_s5 = inlined_call_operand.vmem [shape: f32[1,64], index: 5, kind: input, shape index: {}]   ;;  %s2181_s6 = inlined_call_operand.hbm [shape: f32[2,8,32], index: 6, kind: output, shape index: {}]  }
   0x1   :  { %2187 = sst [smem:[#allocation18_spill]] %s2176_s1 }
   0x2   :  { %11 = vsyncpa [#allocation5], 0 }
   0x3   :  { %13 = vsyncpa [#allocation5 + $0x1], 0 }
   0x4   :  { %14 = vsyncpa [#allocation8], 0 }
   0x5   :  { %15 = vsyncpa [#allocation11], 0 }
   0x6   :  { %16 = vsyncpa [#allocation6], 0 }
   0x7   :  { %18 = vsyncpa [#allocation6 + $0x1], 0  ;;  %s1835_s21 = smov 0   ;;  %s1837_s22 = smov 0  }
   0x8   :  { %s1839_s23 = smov 0   ;;  %s1841_s24 = smov 0  }
   0x9   :  { %s1843_s25 = smov 0   ;;  %s1845_s26 = smov 0  }
   0xa LB: > { %s1315_s27 = sadd.s32 4294967295, %s1778_s26   ;;  %s1316_s28 = sadd.s32 4294967294, %s1778_s26   ;;  %s1778_s26 = sphi %s1845_s26, %s24_s26   ;;  %s1774_s25 = sphi %s1843_s25, %s2210_s25   ;;  %s1770_s24 = sphi %s1841_s24, %s2209_s24   ;;  %s1766_s23 = sphi %s1839_s23, %s2208_s23   ;;  %s1762_s22 = sphi %s1837_s22, %s2207_s22   ;;  %s1758_s21 = sphi %s1835_s21, %s2206_s21  }
   0xb   : > { %p56_p0 = scmp.ne.s32.totalorder %s1762_s22, %s1758_s21  ;;  %p1869_p1 = scmp.eq.s32.totalorder %s1315_s27, 0 }
   0xc   : > { %p1873_p2 = scmp.eq.s32.totalorder %s1315_s27, 1  ;;  %p193_p3 = scmp.eq.s32.totalorder %s1316_s28, 1 }
   0xd   : > { %s2188_s29 = scalar_select %p1869_p1, 1, 0 }
   0xe   : > { %s2189_s30 = scalar_select %p1873_p2, 1, 0 }
   0xf   : > { %p1879_p4 = por %p1869_p1, %p56_p0  ;;  %p1317_p5 = scmp.ge.s32.totalorder %s1778_s26, 1 }
  0x10   : > { %p1884_p6 = por %p193_p3, %p56_p0  ;;  %p200_p7 = scmp.lt.s32.totalorder %s1778_s26, 3 }
  0x11   : > { %s2190_s7 = scalar_select %p1879_p4, 1, 0 }
  0x12   : > { %s2191_s8 = scalar_select %p1884_p6, 1, 0 }
  0x13   : > { %p1889_p8 = pnand %p1317_p5, %p200_p7  ;;  %s1780_s10 = smov [#allocation7]  }
  0x14   : > { %2192 = sst [smem:[#allocation17_spill]] %s2191_s8  ;;  %s213_s11 = sshll.u32 %s1780_s10, 4  ;;  %s214_s11 = int_to_ptr.vmem [resolvable:$true] %s213_s11 }
  0x15   : > { %s2193_s9 = scalar_select %p1889_p8, 1, 0 }
  0x16   : > { %p1466_p10 = pneg %p1889_p8  ;;  %s1781_s12 = smov [#allocation9]  }
  0x17   : > { %s223_s13 = sshll.u32 %s1781_s12, 4  ;;  %s1782_s15 = smov [#allocation10]   ;;  %s1902_s13 = int_to_ptr.vmem [resolvable:$true] %s223_s13 }
  0x18   : > { %p1898_p11 = pnand %p1466_p10, %p1869_p1  ;;  %s1904_s16 = sshll.u32 %s1782_s15, 4  ;;  %s240_s16 = int_to_ptr.vmem [resolvable:$true] %s1904_s16 }
  0x19   : > { %s2195_s1 = sld [smem:[#allocation18_spill]] }
  0x1a   : > { %p1914_p13 = pneg %p1898_p11 }
  0x1f   : > { %s1574_s19 = scalar_lea.hbm %s2195_s1, 128 }
  0x20   : > { %p1575_p12 = scmp.ne.s32.totalorder %s2195_s1, %s1574_s19  ;;  %p1581_p5 = scmp.lt.u32.totalorder %s1574_s19, %s2195_s1 }
  0x22   : > { %p1577_p0 = pnand %p1914_p13, %p1575_p12 }
  0x24   : > { %p1578_p3 = pneg %p1577_p0 }
  0x26   : > { %p1583_p7 = pnand %p1581_p5, %p1578_p3 }
  0x28   : > { %1586 = shalt.err (!%p1583_p7)
}
  0x29   : > { %s1587_s15 = scalar_lea.vmem %s214_s11, 128  ;;  %p1595_p1 = scmp.lt.s32.totalorder %s214_s11, %s214_s11 }
  0x2a   : > { %p1588_p10 = scmp.ne.s32.totalorder %s214_s11, %s1587_s15  ;;  %p1596_p4 = scmp.lt.s32.totalorder %s1587_s15, %s1587_s15 }
  0x2c   : > { %p1590_p9 = pnand %p1588_p10, %p1914_p13  ;;  %p1597_p8 = por %p1596_p4, %p1595_p1 }
  0x2e   : > { %p1591_p6 = pneg %p1590_p9 }
  0x30   : > { %p1598_p2 = pnand %p1597_p8, %p1591_p6 }
  0x32   : > { %1601 = shalt.err (!%p1598_p2)
}
  0x33   : > { %1469 = dma.hbm_to_vmem [thread:$0]  (!%p1898_p11), %s2195_s1, 128, %s214_s11, [#allocation8]  }
  0x34   : > { %s1602_s27 = scalar_lea.hbm %s2177_s2, 512 }
  0x35   : > { %p1603_p9 = scmp.ne.s32.totalorder %s2177_s2, %s1602_s27  ;;  %p1609_p2 = scmp.lt.u32.totalorder %s1602_s27, %s2177_s2 }
  0x37   : > { %p1605_p12 = pnand %p1603_p9, %p1914_p13 }
  0x39   : > { %p1606_p1 = pneg %p1605_p12 }
  0x3b   : > { %p1611_p4 = pnand %p1609_p2, %p1606_p1 }
  0x3d   : > { %1614 = shalt.err (!%p1611_p4)
}
  0x3e   : > { %s1615_s11 = scalar_lea.vmem %s1902_s13, 512  ;;  %p1623_p3 = scmp.lt.s32.totalorder %s1902_s13, %s1902_s13 }
  0x3f   : > { %p1616_p6 = scmp.ne.s32.totalorder %s1902_s13, %s1615_s11  ;;  %p1624_p5 = scmp.lt.s32.totalorder %s1615_s11, %s1615_s11 }
  0x41   : > { %p1618_p8 = pnand %p1616_p6, %p1914_p13  ;;  %p1625_p7 = por %p1624_p5, %p1623_p3 }
  0x43   : > { %p1619_p0 = pneg %p1618_p8 }
  0x45   : > { %p1626_p10 = pnand %p1625_p7, %p1619_p0 }
  0x47   : > { %1629 = shalt.err (!%p1626_p10)
}
  0x48   : > { %s1783_s17 = smov 128   ;;  %s1784_s8 = smov 8  }
  0x49   : > { %1472 = dma.hbm_to_vmem [thread:$0]  (!%p1898_p11), %s2177_s2, 512, %s1902_s13, [#allocation8], %s1783_s17, %s1783_s17, %s1784_s8  }
  0x4a   : > { %s1630_s10 = scalar_lea.hbm %s2179_s4, 512 }
  0x4b   : > { %p1631_p9 = scmp.ne.s32.totalorder %s2179_s4, %s1630_s10  ;;  %p1637_p2 = scmp.lt.u32.totalorder %s1630_s10, %s2179_s4 }
  0x4d   : > { %p1633_p12 = pnand %p1631_p9, %p1914_p13 }
  0x4f   : > { %p1634_p1 = pneg %p1633_p12 }
  0x51   : > { %p1639_p4 = pnand %p1637_p2, %p1634_p1 }
  0x53   : > { %1642 = shalt.err (!%p1639_p4)
}
  0x54   : > { %s1643_s18 = scalar_lea.vmem %s240_s16, 512  ;;  %p1651_p3 = scmp.lt.s32.totalorder %s240_s16, %s240_s16 }
  0x55   : > { %p1644_p6 = scmp.ne.s32.totalorder %s240_s16, %s1643_s18  ;;  %p1652_p5 = scmp.lt.s32.totalorder %s1643_s18, %s1643_s18 }
  0x57   : > { %p1646_p8 = pnand %p1644_p6, %p1914_p13  ;;  %p1653_p7 = por %p1652_p5, %p1651_p3 }
  0x59   : > { %p1647_p0 = pneg %p1646_p8 }
  0x5b   : > { %p1654_p10 = pnand %p1653_p7, %p1647_p0 }
  0x5d   : > { %1657 = shalt.err (!%p1654_p10)
}
  0x5e   : > { %1475 = dma.hbm_to_vmem [thread:$0]  (!%p1898_p11), %s2179_s4, 512, %s240_s16, [#allocation11], %s1783_s17, %s1783_s17, %s1784_s8  }
  0x5f   : > { %s43_s1 = sadd.s32 1, %s1766_s23  ;;  %s36_s28 = sadd.s32 1, %s1774_s25 }
  0x60   : > { %p50_p13 = scmp.ne.s32.totalorder %s1766_s23, %s1762_s22  ;;  %p38_p9 = scmp.ge.s32.totalorder %s36_s28, 2 }
  0x61   : > { %p51_p12 = scmp.eq.s32.totalorder %s1778_s26, 0  ;;  %p2197_p1 = scmp.ne.s32.totalorder %s2189_s30, 0 }
  0x62   : > { %p1487_p4 = scmp.lt.s32.totalorder %s1778_s26, 2  ;;  %s2212_s28 = smov (%p38_p9, %s36_s28), 0 }
  0x63   : > { %p1979_p2 = por %p2197_p1, %p50_p13  ;;  %p52_p6 = por %p51_p12, %p50_p13 }
  0x64   : > { %s256_s20 = sand.u32 1, %s1766_s23   ;;  %s40_s27 = ssub.s32 %s1774_s25, %s2212_s28 }
  0x65   : > { %p41_p8 = scmp.eq.s32.totalorder %s40_s27, 0  ;;  %s1322_s16 = sshll.u32 %s256_s20, 3 }
  0x66   : > { %s1323_s17 = sshll.u32 %s1774_s25, 7  ;;  %s260_s15 = scalar_lea.vmem [#allocation4], %s1322_s16 }
  0x67   : > { %s1991_s8 = scalar_select %p41_p8, %s1766_s23, %s43_s1  }
  0x68   : > { %s1996_s30 = scalar_lea.hbm %s2175_s0, %s1323_s17  ;;  %s267_s11 = sshll.u32 %s260_s15, 4  ;;  %s1998_s11 = int_to_ptr.vmem [resolvable:$true] %s267_s11 }
  0x69   : > { %p2002_p11 = pnand %p1487_p4, %p52_p6  ;;  %s257_s13 = scalar_lea.sflag [#allocation5], %s256_s20 }
  0x6a   : > { %s1658_s19 = scalar_lea.hbm %s1996_s30, 128  ;;  %s1663_s16 = scalar_lea.hbm %s2175_s0, 256 }
  0x6b   : > { %p1659_p0 = scmp.ne.s32.totalorder %s1996_s30, %s1658_s19  ;;  %p1660_p3 = pneg %p2002_p11 }
  0x6c   : > { %p1664_p10 = scmp.lt.u32.totalorder %s1996_s30, %s2175_s0  ;;  %p1665_p13 = scmp.lt.u32.totalorder %s1663_s16, %s1658_s19 }
  0x6d   : > { %p1661_p5 = pnand %p1660_p3, %p1659_p0  ;;  %p1667_p12 = scmp.lt.u32.totalorder %s1658_s19, %s1996_s30 }
  0x6e   : > { %p1666_p9 = por %p1665_p13, %p1664_p10 }
  0x6f   : > { %p1662_p7 = pneg %p1661_p5 }
  0x70   : > { %p1668_p1 = por %p1667_p12, %p1666_p9 }
  0x72   : > { %p1669_p4 = pnand %p1668_p1, %p1662_p7 }
  0x74   : > { %1672 = shalt.err (!%p1669_p4)
}
  0x75   : > { %s1673_s20 = scalar_lea.vmem %s1998_s11, 128  ;;  %s1785_s12 = smov [#allocation4]  }
  0x76   : > { %p1674_p6 = scmp.ne.s32.totalorder %s1998_s11, %s1673_s20  ;;  %s1678_s15 = sshll.u32 %s1785_s12, 4  ;;  %s1679_s15 = int_to_ptr.vmem [resolvable:$false] %s1678_s15 }
  0x77   : > { %s1680_s1 = scalar_lea.vmem %s1679_s15, 256  ;;  %p1681_p5 = scmp.lt.s32.totalorder %s1998_s11, %s1679_s15 }
  0x78   : > { %p1676_p8 = pnand %p1674_p6, %p1660_p3  ;;  %p1682_p10 = scmp.lt.s32.totalorder %s1680_s1, %s1673_s20 }
  0x7a   : > { %p1677_p0 = pneg %p1676_p8  ;;  %p1683_p13 = por %p1682_p10, %p1681_p5 }
  0x7c   : > { %p1684_p9 = pnand %p1683_p13, %p1677_p0 }
  0x7e   : > { %1687 = shalt.err (!%p1684_p9)
}
  0x7f   : > { %1479 = dma.hbm_to_vmem [thread:$0]  (!%p2002_p11), %s1996_s30, 128, %s1998_s11, %s257_s13  }
  0x80   : > { %p2200_p7 = scmp.ne.s32.totalorder %s2193_s9, 0 }
  0x81   : > { %s2034_s19 = sand.u32 (!%p2200_p7), 1, %s1762_s22   ;;  %p2201_p3 = scmp.ne.s32.totalorder (!%p2200_p7), %s2190_s7, 0 }
  0x82   : > { %276 = sbr.rel (%p2200_p7) target bundleno = 1379 (0x563), region = 44  ;;  %s1325_s27 = sshll.u32 (!%p2200_p7), %s2034_s19, 3 }
  0x83   : > { %s279_s16 = scalar_lea.sflag (!%p2200_p7), [#allocation5], %s2034_s19  ;;  %s282_s17 = scalar_lea.vmem (!%p2200_p7), [#allocation4], %s1325_s27 }
  0x89   : > { %1741 = dma.done.wait (%p2201_p3), %s279_s16, 128  }
  0x8a   : > { %1743 = vsyncadd (%p2201_p3), %s279_s16, 4294967168  ;;  %p2202_p11 = scmp.ne.s32.totalorder %s2188_s29, 0 }
  0x8c   : > { %1745 = dma.done.wait (%p2202_p11), [#allocation8], 640  }
  0x8d   : > { %1747 = vsyncadd (%p2202_p11), [#allocation8], 4294966656 }
  0x8e   : > { %1749 = dma.done.wait (%p2202_p11), [#allocation11], 512  }
  0x8f   : > { %1751 = vsyncadd (%p2202_p11), [#allocation11], 4294966784  ;;  %v1786_v0 = vmov 0.0|0.0   ;;  %vm1787_vm0 = vmmov 0   ;;  %v1788_v1 = vmov 0.0   ;;  %v330_v2 = vld [vmem:[#allocation10] sm:$0xff] }
  0x90   : > { %1438 = vmatprep.subr.bf16.mxu0 %v1786_v0  ;;  %1384 = vmatprep.mubr.msk.f32.mxu0 %vm1787_vm0, %v1788_v1  ;;  %v331_v3 = vld [vmem:[#allocation10 + $0x8] sm:$0xff]  ;;  %v332_v4 = vld [vmem:[#allocation10 + $0x10] sm:$0xff]  ;;  %v333_v6 = vld [vmem:[#allocation10 + $0x18] sm:$0xff]  ;;  %vm341_vm1 = vcmask 261120   ;;  %vm415_vm2 = vcmask 523264   ;;  %vm506_vm3 = vcmask 64512  }
  0x91   : > { %1444 = vmatprep.subr.bf16.mxu1 %v1786_v0  ;;  %1395 = vmatprep.mubr.msk.f32.mxu1 %vm1787_vm0, %v1788_v1  ;;  %v1439_v5 = vpack.c.bf16 %v331_v3, %v330_v2  ;;  %v420_v7 = vld [vmem:[#allocation9] sm:$0xff]  ;;  %v421_v8 = vld [vmem:[#allocation9 + $0x8] sm:$0xff]  ;;  %v422_v9 = vld [vmem:[#allocation9 + $0x10] sm:$0xff]  ;;  %v1442_v10 = vpack.c.bf16 %v333_v6, %v332_v4  ;;  %s1789_s11 = smov 112   ;;  %s1790_s18 = smov 120   ;;  %vm842_vm4 = vcmask 130112  }
  0x92   : > { %v327_v11 = vld [vmem:[%s282_s17] sm:$0xff]  ;;  %v328_v12 = vld [vmem:[#allocation7] sm:$0xff]  ;;  %v1445_v13 = vpack.c.bf16 %v421_v8, %v420_v7  ;;  %s1791_s13 = smov 104   ;;  %s1792_s10 = smov 96   ;;  %vm1015_vm5 = vcmask 195712   ;;  %vm1188_vm6 = vcmask 261312  }
  0x93   : > { %1440 = vmatpush3.bf16.msra.mxu0 %v1439_v5  ;;  %v423_v14 = vld [vmem:[#allocation9 + $0x18] sm:$0xff]  ;;  %v329_v16 = vadd.f32 %v328_v12, %v327_v11  ;;  %s1793_s20 = smov 80   ;;  %s1794_s12 = smov 72  }
  0x94   : > { %1441 = vmatprep.subr.bf16.mxu0 %v1786_v0  ;;  %1446 = vmatpush3.bf16.msra.mxu1 %v1445_v13  ;;  %v1448_v15 = vpack.c.bf16 %v423_v14, %v422_v9  ;;  %v1330_v17 = vld [vmem:[%s2180_s5] ss:$0 sm:$0xff]  ;;  %s1795_s15 = smov 88   ;;  %s1796_s1 = smov 8  }
  0x95   : > { %1447 = vmatprep.subr.bf16.mxu1 %v1786_v0  ;;  %v1332_v23 = vld [vmem:[%s2178_s3] ss:$0 sm:$0xff]  ;;  %s1797_s16 = smov 16   ;;  %s1798_s17 = smov 24  }
  0x96   : > { %s1347_s29 = sshll.u32 %s1770_s24, 7  ;;  %s322_s7 = scalar_lea.vmem [#allocation12], %s1325_s27 }
  0x97   : > { %1443 = vmatpush3.bf16.msra.mxu0 %v1442_v10  ;;  %s1207_s9 = sshll.u32 %s322_s7, 4  ;;  %s1799_s24 = smov [#allocation12]   ;;  %s2127_s9 = int_to_ptr.vmem [resolvable:$true] %s1207_s9 }
  0x98   : > { %1398 = vmatprep.subr.mxu0 %v1788_v1  ;;  %1449 = vmatpush3.bf16.msra.mxu1 %v1448_v15  ;;  %s1692_s27 = sshll.u32 %s1799_s24, 4  ;;  %s1693_s27 = int_to_ptr.vmem [resolvable:$false] %s1692_s27 }
  0x99   : > { %1403 = vmatprep.subr.mxu1 %v1788_v1  ;;  %p1695_p6 = scmp.lt.s32.totalorder %s2127_s9, %s1693_s27 }
  0x9a   : > { %1385 = vmatmul.mubr.msk.f32.vlgmr.msra.gmra.mrb[0].mxu0 %vm341_vm1, %v329_v16 }
  0x9b   : > { %1400 = vmatprep.mubr.msk.f32.mxu0 %vm1787_vm0, %v1788_v1  ;;  %1396 = vmatmul.mubr.msk.f32.vlgmr.msra.gmra.mrb[0].mxu1 %vm341_vm1, %v329_v16 }
  0x9c   : > { %1405 = vmatprep.mubr.msk.f32.mxu1 %vm1787_vm0, %v1788_v1 }
 0x16d   : > { %v411_v18 = vpop.f32.mrb[0].mxu0 }
 0x16e   : > { %v412_v19 = vadd.f32 %v1330_v17, %v411_v18  ;;  %v1386_v20 = vpop.f32.mrb[1].mxu0  ;;  %v501_v21 = vpop.f32.mrb[0].mxu1 }
 0x16f   : > { %v1397_v22 = vpop.f32.mrb[1].mxu1  ;;  %v502_v25 = vadd.f32 %v1332_v23, %v501_v21 }
 0x170   : > { %416 = vst.msk [vmem:[#allocation2] sm:$0xff] %vm415_vm2, %v412_v19 }
 0x177   : > { %v2070_v24 = vld [vmem:[#allocation2] sm:$0xff] }
 0x178   : > { %848 = vrot.lane.b32.xlu1 %v2070_v24, %s1789_s11  ;;  %675 = vrot.lane.b32.xlu0 %v2070_v24, %s1790_s18 }
 0x179   : > { %1399 = vmatpush3.xpose.msk.msra.mxu0 %vm506_vm3, %v2070_v24 }
 0x17a   : > { %1408 = vmatprep.subr.mxu0 %v1788_v1 }
 0x17c   : > { %1401 = vmatmul.mubr.msk.f32.vlgmr.msra.gmra.mrb[2].mxu0 %vm506_vm3, %v502_v25  ;;  %845 = vrot.lane.b32.xlu1 %v502_v25, %s1789_s11 }
 0x17d   : > { %672 = vrot.lane.b32.xlu0 %v502_v25, %s1790_s18  ;;  %1410 = vmatprep.mubr.msk.f32.mxu0 %vm1787_vm0, %v1788_v1  ;;  %s2125_s18 = scalar_lea.hbm %s2181_s6, %s1347_s29 }
 0x180   : > { %1018 = vrot.lane.b32.xlu1 %v502_v25, %s1791_s13 }
 0x181   : > { %1021 = vrot.lane.b32.xlu0 %v2070_v24, %s1791_s13  ;;  %s1193_s13 = scalar_lea.sflag [#allocation6], %s2034_s19 }
 0x1ea   : > { %v676_v26 = vpop.permute.xlu0 %675  ;;  %v849_v27 = vpop.permute.xlu1 %848 }
 0x1eb   : > { %1409 = vmatpush3.xpose.msk.msra.mxu0 %vm506_vm3, %v676_v26 }
 0x1ec   : > { %1418 = vmatprep.subr.mxu0 %v1788_v1 }
 0x1ee   : > { %v846_v29 = vpop.permute.xlu1 %845 }
 0x1ef   : > { %v673_v28 = vpop.permute.xlu0 %672 }
 0x1f0   : > { %1411 = vmatmul.mubr.msk.f32.vlgmr.msra.gmra.mrb[4].mxu0 %vm506_vm3, %v673_v28 }
 0x1f1   : > { %1419 = vmatpush3.xpose.msk.msra.mxu0 %vm506_vm3, %v849_v27  ;;  %1420 = vmatprep.mubr.msk.f32.mxu0 %vm1787_vm0, %v1788_v1 }
 0x1f2   : > { %1428 = vmatprep.subr.mxu0 %v1788_v1  ;;  %v1019_v31 = vpop.permute.xlu1 %1018 }
 0x1f3   : > { %v1022_v30 = vpop.permute.xlu0 %1021 }
 0x1f4   : > { %1421 = vmatmul.mubr.msk.f32.vlgmr.msra.gmra.mrb[6].mxu0 %vm506_vm3, %v846_v29 }
 0x1f5   : > { %1429 = vmatpush3.xpose.msk.msra.mxu0 %vm506_vm3, %v1022_v30  ;;  %1430 = vmatprep.mubr.msk.f32.mxu0 %vm1787_vm0, %v1788_v1 }
 0x1f8   : > { %1431 = vmatmul.mubr.msk.f32.vlgmr.msra.gmra.mrb[8].mxu0 %vm506_vm3, %v1019_v31 }
 0x24f   : > { %v579_v32 = vpop.f32.mrb[2].mxu0 }
 0x250   : > { %v1402_v33 = vpop.f32.mrb[3].mxu0  ;;  %v583_v34 = vsel %vm506_vm3, %v579_v32, -inf }
 0x251   : > { %584 = vmax.xlane.f32.xlu0 %v583_v34 }
 0x2c3   : > { %v747_v35 = vpop.f32.mrb[4].mxu0 }
 0x2c4   : > { %v1412_v36 = vpop.f32.mrb[5].mxu0  ;;  %v751_v37 = vsel %vm506_vm3, %v747_v35, -inf }
 0x2c5   : > { %752 = vmax.xlane.f32.xlu1 %v751_v37 }
 0x2c7   : > { %v920_v38 = vpop.f32.mrb[6].mxu0 }
 0x2c8   : > { %v1422_v39 = vpop.f32.mrb[7].mxu0  ;;  %v924_v40 = vsel %vm506_vm3, %v920_v38, -inf }
 0x2c9   : > { %925 = vmax.xlane.f32.xlu0 %v924_v40 }
 0x2cb   : > { %v1093_v41 = vpop.f32.mrb[8].mxu0 }
 0x2cc   : > { %v1432_v42 = vpop.f32.mrb[9].mxu0  ;;  %v1097_v43 = vsel %vm506_vm3, %v1093_v41, -inf }
 0x2cd   : > { %1098 = vmax.xlane.f32.xlu0 %v1097_v43 }
 0x2d6   : > { %594 = vrot.lane.b32.xlu1 %v2070_v24, %s1792_s10  ;;  %s1688_s10 = scalar_lea.vmem %s2127_s9, 128 }
 0x2d7   : > { %p1689_p12 = scmp.ne.s32.totalorder %s2127_s9, %s1688_s10 }
 0x2d9   : > { %p1690_p1 = pnand %p1689_p12, %p1979_p2 }
 0x2db   : > { %p1691_p4 = pneg %p1690_p1 }
 0x2de   : > { %v585_v44 = vpop.xlane.xlu0 %584 }
 0x2df   : > { %v586_v45 = vsub.f32 %v579_v32, %v585_v44 }
 0x2e1   : > { %v587_v46 = vmul.f32 1.442695, %v586_v45 }
 0x2e3   : > { %1558 = vpow2.f32 %v587_v46 }
 0x2ed   : > { %v1559_v47 = vpop.eup %1558 }
 0x2ee   : > { %v589_v48 = vsel %vm506_vm3, %v1559_v47, 0.0 }
 0x2fa   : > { %590 = vadd.xlane.f32.xlu1 %v589_v48 }
 0x352   : > { %v753_v49 = vpop.xlane.xlu1 %752 }
 0x353   : > { %v754_v50 = vsub.f32 %v747_v35, %v753_v49 }
 0x355   : > { %v755_v51 = vmul.f32 1.442695, %v754_v50 }
 0x356   : > { %v595_v52 = vpop.permute.xlu1 %594  ;;  %v926_v53 = vpop.xlane.xlu0 %925 }
 0x357   : > { %1560 = vpow2.f32 %v755_v51  ;;  %v927_v54 = vsub.f32 %v920_v38, %v926_v53  ;;  %1404 = vmatpush3.msra.mxu1 %v595_v52 }
 0x358   : > { %1413 = vmatprep.subr.mxu1 %v1788_v1 }
 0x359   : > { %v928_v55 = vmul.f32 1.442695, %v927_v54 }
 0x35a   : > { %v1099_v56 = vpop.xlane.xlu0 %1098 }
 0x35b   : > { %1562 = vpow2.f32 %v928_v55  ;;  %v1100_v57 = vsub.f32 %v1093_v41, %v1099_v56 }
 0x35d   : > { %v1101_v58 = vmul.f32 1.442695, %v1100_v57 }
 0x35f   : > { %1564 = vpow2.f32 %v1101_v58 }
 0x361   : > { %v1561_v59 = vpop.eup %1560 }
 0x362   : > { %v757_v60 = vsel %vm506_vm3, %v1561_v59, 0.0 }
 0x363   : > { %758 = vadd.xlane.f32.xlu0 %v757_v60 }
 0x365   : > { %v1563_v61 = vpop.eup %1562 }
 0x366   : > { %v930_v62 = vsel %vm506_vm3, %v1563_v61, 0.0 }
 0x367   : > { %931 = vadd.xlane.f32.xlu1 %v930_v62 }
 0x369   : > { %v1565_v63 = vpop.eup %1564 }
 0x36a   : > { %v1103_v0 = vsel %vm506_vm3, %v1565_v63, 0.0 }
 0x36b   : > { %1104 = vadd.xlane.f32.xlu0 %v1103_v0 }
 0x378   : > { %935 = vrot.lane.b32.xlu1 %v2070_v24, %s1793_s20  ;;  %s1694_s20 = scalar_lea.vmem %s1693_s27, 256 }
 0x379   : > { %p1696_p8 = scmp.lt.s32.totalorder %s1694_s20, %s1688_s10 }
 0x37b   : > { %p1697_p0 = por %p1696_p8, %p1695_p6 }
 0x37c   : > { %1108 = vrot.lane.b32.xlu1 %v2070_v24, %s1794_s12 }
 0x37d   : > { %p1698_p5 = pnand %p1697_p0, %p1691_p4 }
 0x381   : > { %762 = vrot.lane.b32.xlu0 %v2070_v24, %s1795_s15 }
 0x387   : > { %v591_v2 = vpop.xlane.xlu1 %590 }
 0x388   : > { %1566 = vrcp.f32 %v591_v2 }
 0x392   : > { %v1567_v3 = vpop.eup %1566 }
 0x393   : > { %v593_v4 = vmul.f32 %v1567_v3, %v1559_v47 }
 0x395   : > { %1406 = vmatmul.mubr.msk.f32.vlgmr.msra.gmra.mrb[2].mxu1 %vm506_vm3, %v593_v4 }
 0x396   : > { %1415 = vmatprep.mubr.msk.f32.mxu1 %vm1787_vm0, %v1788_v1 }
 0x3f0   : > { %v759_v5 = vpop.xlane.xlu0 %758 }
 0x3f1   : > { %1568 = vrcp.f32 %v759_v5 }
 0x3f4   : > { %v932_v6 = vpop.xlane.xlu1 %931 }
 0x3f5   : > { %1570 = vrcp.f32 %v932_v6 }
 0x3f8   : > { %v1105_v7 = vpop.xlane.xlu0 %1104  ;;  %v936_v10 = vpop.permute.xlu1 %935 }
 0x3f9   : > { %1572 = vrcp.f32 %v1105_v7 }
 0x3fb   : > { %v1569_v8 = vpop.eup %1568 }
 0x3fc   : > { %v761_v9 = vmul.f32 %v1569_v8, %v1561_v59  ;;  %v763_v11 = vpop.permute.xlu0 %762  ;;  %v1109_v14 = vpop.permute.xlu1 %1108 }
 0x3fd   : > { %1414 = vmatpush3.msra.mxu1 %v763_v11 }
 0x3fe   : > { %1416 = vmatmul.mubr.msk.f32.vlgmr.msra.gmra.mrb[4].mxu1 %vm506_vm3, %v761_v9  ;;  %1423 = vmatprep.subr.mxu1 %v1788_v1 }
 0x3ff   : > { %v1571_v12 = vpop.eup %1570  ;;  %1424 = vmatpush3.msra.mxu1 %v936_v10  ;;  %1425 = vmatprep.mubr.msk.f32.mxu1 %vm1787_vm0, %v1788_v1 }
 0x400   : > { %v934_v13 = vmul.f32 %v1571_v12, %v1563_v61  ;;  %1433 = vmatprep.subr.mxu1 %v1788_v1 }
 0x402   : > { %1426 = vmatmul.mubr.msk.f32.vlgmr.msra.gmra.mrb[6].mxu1 %vm506_vm3, %v934_v13 }
 0x403   : > { %v1573_v15 = vpop.eup %1572  ;;  %1434 = vmatpush3.msra.mxu1 %v1109_v14  ;;  %1435 = vmatprep.mubr.msk.f32.mxu1 %vm1787_vm0, %v1788_v1 }
 0x404   : > { %v1107_v16 = vmul.f32 %v1573_v15, %v1565_v63 }
 0x406   : > { %1436 = vmatmul.mubr.msk.f32.vlgmr.msra.gmra.mrb[8].mxu1 %vm506_vm3, %v1107_v16 }
 0x468   : > { %v666_v17 = vpop.f32.mrb[2].mxu1 }
 0x469   : > { %670 = vst.msk [vmem:[#allocation3] sm:$0xff] %vm506_vm3, %v666_v17  ;;  %v1407_v18 = vpop.f32.mrb[3].mxu1 }
 0x4d1   : > { %v834_v19 = vpop.f32.mrb[4].mxu1 }
 0x4d2   : > { %839 = vrot.lane.b32.xlu0 %v834_v19, %s1796_s1  ;;  %v1417_v20 = vpop.f32.mrb[5].mxu1 }
 0x4d5   : > { %v1007_v21 = vpop.f32.mrb[6].mxu1 }
 0x4d6   : > { %1012 = vrot.lane.b32.xlu1 %v1007_v21, %s1797_s16  ;;  %v1427_v22 = vpop.f32.mrb[7].mxu1 }
 0x4d9   : > { %v1180_v23 = vpop.f32.mrb[8].mxu1 }
 0x4da   : > { %1185 = vrot.lane.b32.xlu0 %v1180_v23, %s1798_s17  ;;  %v1437_v1 = vpop.f32.mrb[9].mxu1 }
 0x544   : > { %v840_v24 = vpop.permute.xlu0 %839 }
 0x545   : > { %843 = vst.msk [vmem:[#allocation3] sm:$0xff] %vm842_vm4, %v840_v24 }
 0x548   : > { %v1013_v25 = vpop.permute.xlu1 %1012 }
 0x549   : > { %1016 = vst.msk [vmem:[#allocation3] sm:$0xff] %vm1015_vm5, %v1013_v25 }
 0x54c   : > { %v1186_v26 = vpop.permute.xlu0 %1185 }
 0x54d   : > { %1189 = vst.msk [vmem:[#allocation3] sm:$0xff] %vm1188_vm6, %v1186_v26 }
 0x554   : > { %v1190_v27 = vld [vmem:[#allocation3] sm:$0xff] }
 0x555   : > { %1191 = vst.msk [vmem:[%s322_s7] sm:$0xff] %vm341_vm1, %v1190_v27 }
 0x556   : > { %1701 = shalt.err (!%p1698_p5)
}
 0x557   : > { %s1702_s19 = scalar_lea.hbm %s2125_s18, 128  ;;  %s1706_s1 = scalar_lea.hbm %s2181_s6, 256 }
 0x558   : > { %p1703_p10 = scmp.ne.s32.totalorder %s2125_s18, %s1702_s19  ;;  %p1707_p7 = scmp.lt.u32.totalorder %s2125_s18, %s2181_s6 }
 0x559   : > { %p1708_p3 = scmp.lt.u32.totalorder %s1706_s1, %s1702_s19  ;;  %p1710_p12 = scmp.lt.u32.totalorder %s1702_s19, %s2125_s18 }
 0x55a   : > { %p1704_p13 = pnand %p1703_p10, %p1979_p2 }
 0x55b   : > { %p1709_p11 = por %p1708_p3, %p1707_p7 }
 0x55c   : > { %p1705_p9 = pneg %p1704_p13 }
 0x55d   : > { %p1711_p1 = por %p1710_p12, %p1709_p11 }
 0x55f   : > { %p1712_p4 = pnand %p1711_p1, %p1705_p9 }
 0x561   : > { %1715 = shalt.err (!%p1712_p4)
}
 0x562   : > { %1464 = dma.vmem_to_hbm [thread:$0]  (%p1979_p2), %s2127_s9, 128, %s2125_s18, %s1193_s13  }
 0x563 PF: > { %s2203_s29 = sld [smem:[#allocation17_spill]]  ;;  %s1219_s7 = sand.u32 1, %s1758_s21  }
 0x564   : > { %p2205_p8 = scmp.ge.s32.totalorder %s1778_s26, 2  ;;  %s1220_s30 = scalar_lea.sflag [#allocation6], %s1219_s7 }
 0x569   : > { %p2204_p6 = scmp.ne.s32.totalorder %s2203_s29, 0 }
 0x56b   : > { %p1481_p0 = pnand %p2205_p8, %p2204_p6 }
 0x56d   : > { %1753 = dma.done.wait (!%p1481_p0), %s1220_s30, 128  }
 0x56e   : > { %1755 = vsyncadd (!%p1481_p0), %s1220_s30, 4294967168  ;;  %s24_s26 = sadd.s32 1, %s1778_s26   ;;  %s2206_s21 = smov %s1762_s22 }
 0x56f   : > { %p21_p5 = scmp.ge.s32.totalorder %s24_s26, 4   ;;  %s2207_s22 = smov %s1766_s23 }
 0x570   : > { %s2208_s23 = smov %s1991_s8  ;;  %s2209_s24 = smov %s1774_s25 }
 0x571   : > { %s2210_s25 = smov %s2212_s28  ;;  %23 = sbr.rel (!%p21_p5) target bundleno = 10 (0xa), region = 105 }
 0x578   :  { %1225 = vsyncpa [#allocation5], 1 }
 0x579   :  { %1227 = vsyncpa [#allocation5 + $0x1], 1 }
 0x57a   :  { %1228 = vsyncpa [#allocation8], 1 }
 0x57b   :  { %1229 = vsyncpa [#allocation11], 1 }
 0x57c   :  { %1230 = vsyncpa [#allocation6], 1 }
 0x57d   :  { %1232 = vsyncpa [#allocation6 + $0x1], 1 }

</bundles_post_ra>
